<compile_context>
chip_gen: v7x
topology: tpu7x:2x2x1
jax: 0.10.0
libtpu: 0.0.40
codegen_flags: <defaults>
</compile_context>

<pallas_src>
import functools
import math

import jax
import jax.numpy as jnp
from jax.experimental import pallas as pl
from jax.experimental.pallas import tpu as pltpu


# ----------------------------- hardware-aware limits / tiling -----------------------------

def _vmem_limit_bytes():
    cap = 64 * 1024 * 1024  # conservative default = v7x physical VMEM per TensorCore
    try:
        info = pltpu.get_tpu_info()
        cap = int(getattr(info, "vmem_capacity_bytes", cap)) or cap
    except Exception:
        pass
    # ~60% of physical leaves headroom for Mosaic internal scratch + double buffers:
    # ~38 MiB on v7x (64 MiB), ~77 MiB on v5e/v6e (128 MiB).
    return min(int(cap * 0.6), 96 * 1024 * 1024)


_VMEM_LIMIT = _vmem_limit_bytes()

# bf16 exp uses the bf16 EUP on v6e/v7x (the binding slot in attention at hd=64).
# Set False on v5e (no bf16 EUP/VPU -- the converts would outweigh the gain).
_EXP_IN_BF16 = True

# Tile candidates (first divisor wins).  Large tiles minimize weight re-streaming;
# fallback = full dim (always satisfies the (8,128) BlockSpec rule).
_M_TILES = (1024, 512, 256, 128, 64, 32, 16, 8)
_N_TILES = (1024, 768, 512, 256, 128)
_K_TILES = (512, 256, 128)


def _pick_tile(dim, candidates, min_blocks=1):
    for c in candidates:
        if dim % c == 0 and dim // c >= min_blocks:
            return c
    return dim


# ----------------------------- dense (matmul + bias [+ GELU]) -----------------------------

def _dense_kernel(x_ref, w_ref, b_ref, o_ref, acc_ref, *, act):
    k = pl.program_id(2)

    @pl.when(k == 0)
    def _():
        acc_ref[...] = jnp.zeros_like(acc_ref)

    acc_ref[...] += jnp.dot(x_ref[...].astype(jnp.bfloat16),
                            w_ref[...].astype(jnp.bfloat16),
                            preferred_element_type=jnp.float32)

    @pl.when(k == pl.num_programs(2) - 1)
    def _():
        y = acc_ref[...] + b_ref[...]
        if act == "gelu":
            # tanh-approx GELU: goes through the (otherwise idle) EUP slot in the epilogue.
            y = jax.nn.gelu(y, approximate=True)
        o_ref[...] = y.astype(o_ref.dtype)


def dense(x, w, b, act="none"):
    M, K = x.shape
    N = w.shape[1]
    tm = _pick_tile(M, _M_TILES, min_blocks=2)   # keep >=2 blocks for megacore sharding
    tn = _pick_tile(N, _N_TILES)
    tk = _pick_tile(K, _K_TILES)
    return pl.pallas_call(
        functools.partial(_dense_kernel, act=act),
        grid=(M // tm, N // tn, K // tk),
        in_specs=[
            pl.BlockSpec((tm, tk), lambda i, j, k: (i, k)),
            pl.BlockSpec((tk, tn), lambda i, j, k: (k, j)),
            pl.BlockSpec((1, tn), lambda i, j, k: (0, j)),
        ],
        out_specs=pl.BlockSpec((tm, tn), lambda i, j, k: (i, j)),
        out_shape=jax.ShapeDtypeStruct((M, N), jnp.bfloat16),
        scratch_shapes=[pltpu.VMEM((tm, tn), jnp.float32)],
        compiler_params=pltpu.CompilerParams(
            dimension_semantics=("parallel", "parallel", "arbitrary"),
            vmem_limit_bytes=_VMEM_LIMIT,
        ),
    )(x, w, b.reshape(1, N))


# ----------------------------- dense + residual + LayerNorm (fused) -----------------------------

def _dense_add_ln_kernel(x_ref, w_ref, b_ref, r_ref, g_ref, bb_ref, o_ref, acc_ref, *, eps):
    k = pl.program_id(1)

    @pl.when(k == 0)
    def _():
        acc_ref[...] = jnp.zeros_like(acc_ref)

    acc_ref[...] += jnp.dot(x_ref[...].astype(jnp.bfloat16),
                            w_ref[...].astype(jnp.bfloat16),
                            preferred_element_type=jnp.float32)

    @pl.when(k == pl.num_programs(1) - 1)
    def _():
        y = acc_ref[...] + b_ref[...] + r_ref[...].astype(jnp.float32)
        mean = jnp.mean(y, axis=-1, keepdims=True)
        var = jnp.mean(jnp.square(y - mean), axis=-1, keepdims=True)
        o_ref[...] = ((y - mean) * jax.lax.rsqrt(var + eps) * g_ref[...]
                      + bb_ref[...]).astype(o_ref.dtype)


def dense_add_ln(x, w, b, residual, gamma, beta, eps=1e-12):
    M, K = x.shape
    N = w.shape[1]          # = hidden; LN needs the full row, so N is not tiled
    tm = _pick_tile(M, _M_TILES, min_blocks=2)
    tk = _pick_tile(K, _K_TILES)
    return pl.pallas_call(
        functools.partial(_dense_add_ln_kernel, eps=eps),
        grid=(M // tm, K // tk),
        in_specs=[
            pl.BlockSpec((tm, tk), lambda i, k: (i, k)),
            pl.BlockSpec((tk, N), lambda i, k: (k, 0)),
            pl.BlockSpec((1, N), lambda i, k: (0, 0)),
            pl.BlockSpec((tm, N), lambda i, k: (i, 0)),   # residual (kept resident across k)
            pl.BlockSpec((1, N), lambda i, k: (0, 0)),
            pl.BlockSpec((1, N), lambda i, k: (0, 0)),
        ],
        out_specs=pl.BlockSpec((tm, N), lambda i, k: (i, 0)),
        out_shape=jax.ShapeDtypeStruct((M, N), jnp.bfloat16),
        scratch_shapes=[pltpu.VMEM((tm, N), jnp.float32)],
        compiler_params=pltpu.CompilerParams(
            dimension_semantics=("parallel", "arbitrary"),
            vmem_limit_bytes=_VMEM_LIMIT,
        ),
    )(x, w, b.reshape(1, N), residual, gamma.reshape(1, N), beta.reshape(1, N))


# ----------------------------- embedding sum + LayerNorm (fused, no HBM emb tensor) -----------------------------

def _emb_ln_kernel(w_ref, p_ref, t_ref, g_ref, b_ref, o_ref, *, eps):
    x = w_ref[0].astype(jnp.float32) + p_ref[...] + t_ref[...]
    mean = jnp.mean(x, axis=-1, keepdims=True)
    var = jnp.mean(jnp.square(x - mean), axis=-1, keepdims=True)
    o_ref[0] = ((x - mean) * jax.lax.rsqrt(var + eps) * g_ref[...]
                + b_ref[...]).astype(o_ref.dtype)


def embed_layernorm(word, pos, typ, gamma, beta, eps=1e-12):
    """word: (B,S,H) gathered token embeddings; pos: (S,H); typ: (1,H). -> (B*S,H) bf16."""
    B, S, H = word.shape
    ts = _pick_tile(S, (512, 256, 128, 64, 32, 16, 8))
    out = pl.pallas_call(
        functools.partial(_emb_ln_kernel, eps=eps),
        grid=(B, S // ts),
        in_specs=[
            pl.BlockSpec((1, ts, H), lambda b, s: (b, s, 0)),
            pl.BlockSpec((ts, H), lambda b, s: (s, 0)),
            pl.BlockSpec((1, H), lambda b, s: (0, 0)),
            pl.BlockSpec((1, H), lambda b, s: (0, 0)),
            pl.BlockSpec((1, H), lambda b, s: (0, 0)),
        ],
        out_specs=pl.BlockSpec((1, ts, H), lambda b, s: (b, s, 0)),
        out_shape=jax.ShapeDtypeStruct((B, S, H), jnp.bfloat16),
        compiler_params=pltpu.CompilerParams(
            dimension_semantics=("parallel", "parallel"),
            vmem_limit_bytes=_VMEM_LIMIT,
        ),
    )(word, pos, typ, gamma.reshape(1, H), beta.reshape(1, H))
    return out.reshape(B * S, H)


# ----------------------------- attention (flash-style, all heads per block) -----------------------------

def _attn_kernel(q_ref, k_ref, v_ref, o_ref, m_ref, l_ref, acc_ref, *, nh, hd, hpg, gw):
    ki = pl.program_id(2)

    @pl.when(ki == 0)
    def _():
        m_ref[...] = jnp.full_like(m_ref, -jnp.inf)
        l_ref[...] = jnp.zeros_like(l_ref)
        acc_ref[...] = jnp.zeros_like(acc_ref)

    dn = (((1,), (1,)), ((), ()))  # contract head_dim of both operands: q @ k^T
    n_groups = nh // hpg
    for g in range(n_groups):
        # One 128-lane-aligned load per group; heads within the group sliced in-register.
        qg = q_ref[0, :, pl.ds(g * gw, gw)].astype(jnp.bfloat16)   # (tq,  gw)
        kg = k_ref[0, :, pl.ds(g * gw, gw)].astype(jnp.bfloat16)   # (tkv, gw)
        vg = v_ref[0, :, pl.ds(g * gw, gw)].astype(jnp.bfloat16)   # (tkv, gw)
        for hi in range(hpg):
            h = g * hpg + hi
            qh = qg[:, hi * hd:(hi + 1) * hd]
            kh = kg[:, hi * hd:(hi + 1) * hd]
            vh = vg[:, hi * hd:(hi + 1) * hd]

            # scale 1/sqrt(hd) is folded into wq/bq at prepare_params time.
            s = jax.lax.dot_general(qh, kh, dn, preferred_element_type=jnp.float32)
            m_prev = m_ref[h]                                                   # (tq, 1)
            m_new = jnp.maximum(m_prev, jnp.max(s, axis=-1, keepdims=True))
            alpha = jnp.exp(m_prev - m_new)
            if _EXP_IN_BF16:
                p = jnp.exp((s - m_new).astype(jnp.bfloat16))                   # bf16 EUP
            else:
                p = jnp.exp(s - m_new)
            l_ref[h] = alpha * l_ref[h] + jnp.sum(p.astype(jnp.float32),
                                                  axis=-1, keepdims=True)
            acc_ref[h] = alpha * acc_ref[h] + jnp.dot(
                p.astype(jnp.bfloat16), vh, preferred_element_type=jnp.float32)
            m_ref[h] = m_new

    @pl.when(ki == pl.num_programs(2) - 1)
    def _():
        # Per-head slice stores (no lane-relayout concatenate); output stays lane-dense.
        for h in range(nh):
            o_ref[0, :, pl.ds(h * hd, hd)] = (
                acc_ref[h] * pl.reciprocal(l_ref[h], approx=True)).astype(o_ref.dtype)


def attention(qkv, B, S, H, nh):
    """qkv: (B*S, 3H) fused projection output (bf16).  Returns (B*S, H) bf16 context."""
    hd = H // nh
    tq = _pick_tile(S, (512, 256, 128, 64, 32, 16, 8))
    tkv = _pick_tile(S, (512, 256, 128, 64, 32, 16, 8))

    # Group heads so every VMEM load is a multiple of 128 lanes (e.g. 2 heads at hd=64).
    if hd % 128 == 0:
        hpg, gw = 1, hd
    elif 128 % hd == 0 and H % 128 == 0:
        hpg, gw = 128 // hd, 128
    else:
        hpg, gw = 1, hd      # lane-unaligned fallback for exotic head sizes

    if H % 128 == 0:
        # Read Q/K/V straight out of the fused QKV tensor via lane-block offsets:
        # no JAX-side slicing or head-split transposes (zero extra HBM passes).
        q_arr = k_arr = v_arr = qkv.reshape(B, S, 3 * H)
        q_off, k_off, v_off = 0, 1, 2
    else:
        # Fallback for lane-unaligned hidden sizes.
        q_arr = qkv[:, :H].reshape(B, S, H)
        k_arr = qkv[:, H:2 * H].reshape(B, S, H)
        v_arr = qkv[:, 2 * H:].reshape(B, S, H)
        q_off = k_off = v_off = 0

    out = pl.pallas_call(
        functools.partial(_attn_kernel, nh=nh, hd=hd, hpg=hpg, gw=gw),
        grid=(B, S // tq, S // tkv),
        in_specs=[
            pl.BlockSpec((1, tq, H), lambda b, qi, ki: (b, qi, q_off)),
            pl.BlockSpec((1, tkv, H), lambda b, qi, ki: (b, ki, k_off)),
            pl.BlockSpec((1, tkv, H), lambda b, qi, ki: (b, ki, v_off)),
        ],
        out_specs=pl.BlockSpec((1, tq, H), lambda b, qi, ki: (b, qi, 0)),
        out_shape=jax.ShapeDtypeStruct((B, S, H), jnp.bfloat16),
        scratch_shapes=[
            pltpu.VMEM((nh, tq, 1), jnp.float32),   # running max
            pltpu.VMEM((nh, tq, 1), jnp.float32),   # running denom
            pltpu.VMEM((nh, tq, hd), jnp.float32),  # running numerator
        ],
        compiler_params=pltpu.CompilerParams(
            dimension_semantics=("parallel", "parallel", "arbitrary"),
            vmem_limit_bytes=_VMEM_LIMIT,
        ),
    )(q_arr, k_arr, v_arr)
    return out.reshape(B * S, H)
    # TODO(synk): attention mask for padded batches (all sequences assumed unpadded here).


# ----------------------------- classifier head (tiny; single block) -----------------------------

def _classifier_kernel(x_ref, w_ref, b_ref, o_ref):
    logits = jnp.dot(x_ref[...].astype(jnp.float32), w_ref[...],
                     preferred_element_type=jnp.float32)
    logits = logits + b_ref[...]
    m = jnp.max(logits, axis=-1, keepdims=True)
    e = jnp.exp(logits - m)
    o_ref[...] = e / jnp.sum(e, axis=-1, keepdims=True)   # exact div: softmax sum == 1


def classify(x, w, b):
    B, H = x.shape
    L = w.shape[1]
    return pl.pallas_call(
        _classifier_kernel,
        grid=(1,),
        in_specs=[
            pl.BlockSpec((B, H), lambda i: (0, 0)),
            pl.BlockSpec((H, L), lambda i: (0, 0)),
            pl.BlockSpec((1, L), lambda i: (0, 0)),
        ],
        out_specs=pl.BlockSpec((B, L), lambda i: (0, 0)),
        out_shape=jax.ShapeDtypeStruct((B, L), jnp.float32),
        compiler_params=pltpu.CompilerParams(dimension_semantics=("arbitrary",)),
    )(x, w, b.reshape(1, L))


# ----------------------------- Parameter init / prep -----------------------------

def init_params(key, cfg):
    H, L = cfg["hidden"], cfg["layers"]
    I, V, P, T, C = cfg["inter"], cfg["vocab"], cfg["max_pos"], cfg["types"], cfg["labels"]

    def nrm(k, shape, scale=0.02):
        return scale * jax.random.normal(k, shape, dtype=jnp.float32)

    keys = iter(jax.random.split(key, 8 + 14 * L))
    params = {
        "word_emb": nrm(next(keys), (V, H)),
        "pos_emb": nrm(next(keys), (P, H)),
        "type_emb": nrm(next(keys), (T, H)),
        "emb_ln_g": jnp.ones((H,), jnp.float32),
        "emb_ln_b": jnp.zeros((H,), jnp.float32),
        "cls_w": nrm(next(keys), (H, C)),
        "cls_b": jnp.zeros((C,), jnp.float32),
        "layers": [],
    }
    for _ in range(L):
        params["layers"].append({
            "wq": nrm(next(keys), (H, H)), "bq": jnp.zeros((H,), jnp.float32),
            "wk": nrm(next(keys), (H, H)), "bk": jnp.zeros((H,), jnp.float32),
            "wv": nrm(next(keys), (H, H)), "bv": jnp.zeros((H,), jnp.float32),
            "wo": nrm(next(keys), (H, H)), "bo": jnp.zeros((H,), jnp.float32),
            "ln1_g": jnp.ones((H,), jnp.float32), "ln1_b": jnp.zeros((H,), jnp.float32),
            "w1": nrm(next(keys), (H, I)), "b1": jnp.zeros((I,), jnp.float32),
            "w2": nrm(next(keys), (I, H)), "b2": jnp.zeros((H,), jnp.float32),
            "ln2_g": jnp.ones((H,), jnp.float32), "ln2_b": jnp.zeros((H,), jnp.float32),
        })
    return params


def prepare_params(params, cfg):
    """One-time prep: fuse Q|K|V projection weights, fold the 1/sqrt(head_dim) softmax
    scale into wq/bq, and pre-cast matmul weights to bf16 (halves weight HBM traffic;
    accumulation stays f32 inside the kernels)."""
    H, nh = cfg["hidden"], cfg["heads"]
    scale = 1.0 / math.sqrt(H // nh)
    prep = {k: params[k] for k in ("word_emb", "pos_emb", "type_emb",
                                   "emb_ln_g", "emb_ln_b", "cls_w", "cls_b")}
    prep["layers"] = []
    for lyr in params["layers"]:
        prep["layers"].append({
            "wqkv": jnp.concatenate([lyr["wq"] * scale, lyr["wk"], lyr["wv"]],
                                    axis=1).astype(jnp.bfloat16),
            "bqkv": jnp.concatenate([lyr["bq"] * scale, lyr["bk"], lyr["bv"]]),
            "wo": lyr["wo"].astype(jnp.bfloat16), "bo": lyr["bo"],
            "w1": lyr["w1"].astype(jnp.bfloat16), "b1": lyr["b1"],
            "w2": lyr["w2"].astype(jnp.bfloat16), "b2": lyr["b2"],
            "ln1_g": lyr["ln1_g"], "ln1_b": lyr["ln1_b"],
            "ln2_g": lyr["ln2_g"], "ln2_b": lyr["ln2_b"],
        })
    return prep


# ----------------------------- Forward pass -----------------------------

def scibert_forward(params, ids, cfg):
    B, S = ids.shape
    H, nh = cfg["hidden"], cfg["heads"]

    # Embeddings: gather is glue; sum + LayerNorm fused in one Pallas kernel
    # (no (B*S,H) emb tensor materialized in HBM).
    word = jnp.take(params["word_emb"], ids, axis=0)                 # (B, S, H)
    pos = params["pos_emb"][:S]                                      # (S, H)
    typ = params["type_emb"][0:1]                                    # single-segment (type 0)
    x = embed_layernorm(word, pos, typ, params["emb_ln_g"], params["emb_ln_b"])

    for lyr in params["layers"]:
        qkv = dense(x, lyr["wqkv"], lyr["bqkv"])               # fused Q|K|V: (B*S, 3H) bf16
        ctx = attention(qkv, B, S, H, nh)                      # flash-style, (B*S, H) bf16
        x = dense_add_ln(ctx, lyr["wo"], lyr["bo"], x,         # out-proj + residual + LN
                         lyr["ln1_g"], lyr["ln1_b"])
        h = dense(x, lyr["w1"], lyr["b1"], act="gelu")         # FFN up + GELU (tanh approx)
        x = dense_add_ln(h, lyr["w2"], lyr["b2"], x,           # FFN down + residual + LN
                         lyr["ln2_g"], lyr["ln2_b"])

    pooled = x.reshape(B, S, H)[:, 0, :]                       # CLS token; dropout = id (eval)
    return classify(pooled, params["cls_w"], params["cls_b"])  # Linear + softmax fused


# ----------------------------- Main -----------------------------

if __name__ == "__main__":
    # Small but lane-aligned config (real SciBERT: hidden=768, heads=12, inter=3072
    # — also a multiple of 128, so the same no-transpose QKV / head-group paths apply).
    cfg = dict(hidden=128, heads=4, layers=2, inter=256,
               vocab=256, max_pos=64, types=2, labels=5)
    B, S = 2, 8

    key = jax.random.PRNGKey(0)
    params = prepare_params(init_params(key, cfg), cfg)
    ids = jax.random.randint(key, (B, S), 0, cfg["vocab"], dtype=jnp.int32)

    probs = jax.block_until_ready(scibert_forward(params, ids, cfg))

    assert probs.shape == (B, cfg["labels"])
    assert bool(jnp.all(jnp.isfinite(probs)))
    assert bool(jnp.allclose(jnp.sum(probs, axis=1), 1.0, atol=1e-5))
    print("KERNEL_OK")
</pallas_src>

<mosaic_0001>
module attributes {stable_mosaic.version = 11 : i64} {
  func.func @_emb_ln_kernel(%arg0: i32, %arg1: i32, %arg2: memref<1x8x128xf32, #tpu.memory_space<vmem>>, %arg3: memref<8x128xf32, #tpu.memory_space<vmem>>, %arg4: memref<1x128xf32, #tpu.memory_space<vmem>>, %arg5: memref<1x128xf32, #tpu.memory_space<vmem>>, %arg6: memref<1x128xf32, #tpu.memory_space<vmem>>, %arg7: memref<1x8x128xbf16, #tpu.memory_space<vmem>>) attributes {dimension_semantics = [#tpu.dimension_semantics<parallel>, #tpu.dimension_semantics<parallel>], iteration_bounds = array<i64: 2, 1>, scalar_prefetch = 0 : i64, scratch_operands = 0 : i64, tpu.core_type = #tpu.core_type<tc>, window_params = [{transform_indices = @transform_0, window_bounds = array<i64: 1, 8, 128>}, {transform_indices = @transform_1, window_bounds = array<i64: 8, 128>}, {pipeline_mode = #tpu.pipeline_mode<synchronous>, transform_indices = @transform_2, window_bounds = array<i64: 1, 128>}, {pipeline_mode = #tpu.pipeline_mode<synchronous>, transform_indices = @transform_3, window_bounds = array<i64: 1, 128>}, {pipeline_mode = #tpu.pipeline_mode<synchronous>, transform_indices = @transform_4, window_bounds = array<i64: 1, 128>}, {transform_indices = @transform_5, window_bounds = array<i64: 1, 8, 128>}]} {
    %c0 = arith.constant 0 : index
    %c0_0 = arith.constant 0 : index
    %c0_1 = arith.constant 0 : index
    %0 = vector.load %arg2[%c0, %c0_0, %c0_1] : memref<1x8x128xf32, #tpu.memory_space<vmem>>, vector<1x8x128xf32>
    %1 = vector.shape_cast %0 : vector<1x8x128xf32> to vector<8x128xf32>
    %c0_2 = arith.constant 0 : index
    %c0_3 = arith.constant 0 : index
    %2 = vector.load %arg3[%c0_2, %c0_3] : memref<8x128xf32, #tpu.memory_space<vmem>>, vector<8x128xf32>
    %3 = arith.addf %1, %2 : vector<8x128xf32>
    %c0_4 = arith.constant 0 : index
    %c0_5 = arith.constant 0 : index
    %4 = vector.load %arg4[%c0_4, %c0_5] : memref<1x128xf32, #tpu.memory_space<vmem>>, vector<1x128xf32>
    %5 = vector.broadcast %4 : vector<1x128xf32> to vector<8x128xf32>
    %6 = arith.addf %3, %5 : vector<8x128xf32>
    %cst = arith.constant dense<0.000000e+00> : vector<8xf32>
    %7 = vector.multi_reduction <add>, %6, %cst [1] : vector<8x128xf32> to vector<8xf32>
    %8 = vector.shape_cast %7 : vector<8xf32> to vector<8x1xf32>
    %cst_6 = arith.constant 1.280000e+02 : f32
    %9 = vector.broadcast %cst_6 : f32 to vector<8x1xf32>
    %10 = arith.divf %8, %9 : vector<8x1xf32>
    %11 = vector.broadcast %10 : vector<8x1xf32> to vector<8x128xf32>
    %12 = arith.subf %6, %11 : vector<8x128xf32>
    %13 = arith.mulf %12, %12 : vector<8x128xf32>
    %cst_7 = arith.constant dense<0.000000e+00> : vector<8xf32>
    %14 = vector.multi_reduction <add>, %13, %cst_7 [1] : vector<8x128xf32> to vector<8xf32>
    %15 = vector.shape_cast %14 : vector<8xf32> to vector<8x1xf32>
    %cst_8 = arith.constant 1.280000e+02 : f32
    %16 = vector.broadcast %cst_8 : f32 to vector<8x1xf32>
    %17 = arith.divf %15, %16 : vector<8x1xf32>
    %18 = vector.broadcast %10 : vector<8x1xf32> to vector<8x128xf32>
    %19 = arith.subf %6, %18 : vector<8x128xf32>
    %cst_9 = arith.constant 9.99999996E-13 : f32
    %20 = vector.broadcast %cst_9 : f32 to vector<8x1xf32>
    %21 = arith.addf %17, %20 : vector<8x1xf32>
    %22 = math.rsqrt %21 : vector<8x1xf32>
    %23 = vector.broadcast %22 : vector<8x1xf32> to vector<8x128xf32>
    %24 = arith.mulf %19, %23 : vector<8x128xf32>
    %c0_10 = arith.constant 0 : index
    %c0_11 = arith.constant 0 : index
    %25 = vector.load %arg5[%c0_10, %c0_11] : memref<1x128xf32, #tpu.memory_space<vmem>>, vector<1x128xf32>
    %26 = vector.broadcast %25 : vector<1x128xf32> to vector<8x128xf32>
    %27 = arith.mulf %24, %26 : vector<8x128xf32>
    %c0_12 = arith.constant 0 : index
    %c0_13 = arith.constant 0 : index
    %28 = vector.load %arg6[%c0_12, %c0_13] : memref<1x128xf32, #tpu.memory_space<vmem>>, vector<1x128xf32>
    %29 = vector.broadcast %28 : vector<1x128xf32> to vector<8x128xf32>
    %30 = arith.addf %27, %29 : vector<8x128xf32>
    %31 = arith.truncf %30 : vector<8x128xf32> to vector<8x128xbf16>
    %c0_14 = arith.constant 0 : index
    %c0_15 = arith.constant 0 : index
    %c0_16 = arith.constant 0 : index
    %32 = vector.load %arg7[%c0_14, %c0_15, %c0_16] : memref<1x8x128xbf16, #tpu.memory_space<vmem>>, vector<1x8x128xbf16>
    %33 = vector.shape_cast %32 : vector<1x8x128xbf16> to vector<8x128xbf16>
    %34 = vector.shape_cast %31 : vector<8x128xbf16> to vector<1x8x128xbf16>
    tpu.vector_store %arg7[%c0_14, %c0_15, %c0_16], %34 {strides = array<i32>} : memref<1x8x128xbf16, #tpu.memory_space<vmem>>, vector<1x8x128xbf16>,
    return
  }
  func.func @transform_0(%arg0: i32, %arg1: i32) -> (i32, i32, i32) {
    %c0_i32 = arith.constant 0 : i32
    %c0_i32_0 = arith.constant 0 : i32
    return %arg0, %arg1, %c0_i32 : i32, i32, i32
  }
  func.func @transform_1(%arg0: i32, %arg1: i32) -> (i32, i32) {
    %c0_i32 = arith.constant 0 : i32
    %c0_i32_0 = arith.constant 0 : i32
    return %arg1, %c0_i32 : i32, i32
  }
  func.func @transform_2(%arg0: i32, %arg1: i32) -> (i32, i32) {
    %c0_i32 = arith.constant 0 : i32
    %c0_i32_0 = arith.constant 0 : i32
    %c0_i32_1 = arith.constant 0 : i32
    return %c0_i32, %c0_i32_0 : i32, i32
  }
  func.func @transform_3(%arg0: i32, %arg1: i32) -> (i32, i32) {
    %c0_i32 = arith.constant 0 : i32
    %c0_i32_0 = arith.constant 0 : i32
    %c0_i32_1 = arith.constant 0 : i32
    return %c0_i32, %c0_i32_0 : i32, i32
  }
  func.func @transform_4(%arg0: i32, %arg1: i32) -> (i32, i32) {
    %c0_i32 = arith.constant 0 : i32
    %c0_i32_0 = arith.constant 0 : i32
    %c0_i32_1 = arith.constant 0 : i32
    return %c0_i32, %c0_i32_0 : i32, i32
  }
  func.func @transform_5(%arg0: i32, %arg1: i32) -> (i32, i32, i32) {
    %c0_i32 = arith.constant 0 : i32
    %c0_i32_0 = arith.constant 0 : i32
    return %arg0, %arg1, %c0_i32 : i32, i32, i32
  }
}

</mosaic_0001>

<bundles_post_ra>
// kernel: tpu_custom_call.1
= control target key start
LH: loop header
LB: loop body
LE: loop exit
PB: predicated region body
PF: predicated region fallthrough
CT: control target
= control target key end

     0   :  { %10 = vsyncpa [#allocation3], 0  ;;  %s923_s0 = inlined_call_operand.hbm [shape: f32[2,8,128], index: 0, kind: input, shape index: {}]   ;;  %s924_s1 = inlined_call_operand.hbm [shape: f32[8,128], index: 1, kind: input, shape index: {}]   ;;  %s925_s2 = inlined_call_operand.vmem [shape: f32[1,128], index: 2, kind: input, shape index: {}]   ;;  %s926_s3 = inlined_call_operand.vmem [shape: f32[1,128], index: 3, kind: input, shape index: {}]   ;;  %s927_s4 = inlined_call_operand.vmem [shape: f32[1,128], index: 4, kind: input, shape index: {}]   ;;  %s928_s5 = inlined_call_operand.hbm [shape: bf16[2,8,128], index: 5, kind: output, shape index: {}]  }
   0x1   :  { %12 = vsyncpa [#allocation3 + $0x1], 0 }
   0x2   :  { %13 = vsyncpa [#allocation6], 0 }
   0x3   :  { %14 = vsyncpa [#allocation4], 0 }
   0x4   :  { %16 = vsyncpa [#allocation4 + $0x1], 0  ;;  %s697_s18 = smov 0   ;;  %s699_s19 = smov 0  }
   0x5   :  { %s701_s20 = smov 0   ;;  %s703_s21 = smov 0  }
   0x6   :  { %s705_s22 = smov 0   ;;  %s707_s23 = smov 0  }
   0x7 LB: > { %s425_s24 = sadd.s32 4294967295, %s662_s23   ;;  %s426_s25 = sadd.s32 4294967294, %s662_s23   ;;  %s662_s23 = sphi %s707_s23, %s22_s23   ;;  %s658_s22 = sphi %s705_s22, %s953_s22   ;;  %s654_s21 = sphi %s703_s21, %s952_s21   ;;  %s650_s20 = sphi %s701_s20, %s951_s20   ;;  %s646_s19 = sphi %s699_s19, %s950_s19   ;;  %s642_s18 = sphi %s697_s18, %s949_s18  }
   0x8   : > { %p56_p0 = scmp.ne.s32.totalorder %s646_s19, %s642_s18  ;;  %p731_p1 = scmp.eq.s32.totalorder %s425_s24, 0 }
   0x9   : > { %p735_p2 = scmp.eq.s32.totalorder %s425_s24, 1  ;;  %p177_p3 = scmp.eq.s32.totalorder %s426_s25, 1 }
   0xa   : > { %s933_s26 = scalar_select %p731_p1, 1, 0 }
   0xb   : > { %s934_s27 = scalar_select %p735_p2, 1, 0 }
   0xc   : > { %p741_p4 = por %p731_p1, %p56_p0  ;;  %p427_p5 = scmp.ge.s32.totalorder %s662_s23, 1 }
   0xd   : > { %p746_p6 = por %p177_p3, %p56_p0  ;;  %p184_p7 = scmp.lt.s32.totalorder %s662_s23, 3 }
   0xe   : > { %s935_s28 = scalar_select %p741_p4, 1, 0 }
   0xf   : > { %s936_s29 = scalar_select %p746_p6, 1, 0 }
  0x10   : > { %p751_p8 = pnand %p427_p5, %p184_p7  ;;  %s664_s6 = smov [#allocation5]  }
  0x11   : > { %s199_s7 = sshll.u32 %s664_s6, 4  ;;  %s34_s9 = sadd.s32 1, %s658_s22  ;;  %s200_s7 = int_to_ptr.vmem [resolvable:$true] %s199_s7 }
  0x12   : > { %s937_s30 = scalar_select %p751_p8, 1, 0 }
  0x13   : > { %p451_p10 = pneg %p751_p8  ;;  %s43_s10 = sadd.s32 1, %s650_s20 }
  0x14   : > { %p766_p12 = scmp.ge.s32.totalorder %s34_s9, 2  ;;  %s518_s14 = scalar_lea.hbm %s924_s1, 128 }
  0x15   : > { %p760_p11 = pnand %p451_p10, %p731_p1  ;;  %p519_p13 = scmp.ne.s32.totalorder %s924_s1, %s518_s14 }
  0x16   : > { %s939_s11 = scalar_select %p766_p12, 1, 0 }
  0x17   : > { %p520_p0 = pneg %p760_p11  ;;  %p525_p7 = scmp.lt.u32.totalorder %s518_s14, %s924_s1 }
  0x19   : > { %p521_p3 = pnand %p520_p0, %p519_p13 }
  0x1b   : > { %p522_p5 = pneg %p521_p3 }
  0x1d   : > { %p527_p10 = pnand %p525_p7, %p522_p5 }
  0x1f   : > { %530 = shalt.err (!%p527_p10)
}
  0x20   : > { %s531_s25 = scalar_lea.vmem %s200_s7, 128  ;;  %p539_p4 = scmp.lt.s32.totalorder %s200_s7, %s200_s7 }
  0x21   : > { %p532_p9 = scmp.ne.s32.totalorder %s200_s7, %s531_s25  ;;  %p540_p8 = scmp.lt.s32.totalorder %s531_s25, %s531_s25 }
  0x23   : > { %p534_p6 = pnand %p532_p9, %p520_p0  ;;  %p541_p2 = por %p540_p8, %p539_p4 }
  0x25   : > { %p535_p1 = pneg %p534_p6 }
  0x27   : > { %p542_p12 = pnand %p541_p2, %p535_p1 }
  0x29   : > { %545 = shalt.err (!%p542_p12)
}
  0x2a   : > { %454 = dma.hbm_to_vmem [thread:$0]  (!%p760_p11), %s924_s1, 128, %s200_s7, [#allocation6]  }
  0x2b   : > { %p940_p4 = scmp.ne.s32.totalorder %s939_s11, 0  ;;  %p50_p1 = scmp.ne.s32.totalorder %s650_s20, %s646_s19 }
  0x2c   : > { %p51_p2 = scmp.eq.s32.totalorder %s662_s23, 0  ;;  %p464_p6 = scmp.lt.s32.totalorder %s662_s23, 2 }
  0x2d   : > { %s955_s9 = smov (%p940_p4, %s34_s9), 0  ;;  %p941_p12 = scmp.ne.s32.totalorder %s934_s27, 0 }
  0x2e   : > { %s38_s8 = ssub.s32 %s658_s22, %s955_s9  ;;  %p52_p9 = por %p51_p2, %p50_p1 }
  0x2f   : > { %p41_p8 = scmp.eq.s32.totalorder %s38_s8, 0  ;;  %p798_p13 = por %p941_p12, %p50_p1 }
  0x30   : > { %s219_s14 = sand.u32 1, %s650_s20   ;;  %s431_s11 = sshll.u32 %s658_s22, 7 }
  0x31   : > { %s806_s15 = scalar_select %p41_p8, %s650_s20, %s43_s10  }
  0x32   : > { %s430_s7 = sshll.u32 %s219_s14, 3  ;;  %s812_s24 = scalar_lea.hbm %s923_s0, %s431_s11 }
  0x33   : > { %s223_s27 = scalar_lea.vmem [#allocation2], %s430_s7  ;;  %p816_p11 = pnand %p464_p6, %p52_p9 }
  0x34   : > { %s231_s25 = sshll.u32 %s223_s27, 4  ;;  %s220_s10 = scalar_lea.sflag [#allocation3], %s219_s14  ;;  %s814_s25 = int_to_ptr.vmem [resolvable:$true] %s231_s25 }
  0x35   : > { %s546_s12 = scalar_lea.hbm %s812_s24, 128  ;;  %p548_p3 = pneg %p816_p11 }
  0x36   : > { %p547_p0 = scmp.ne.s32.totalorder %s812_s24, %s546_s12  ;;  %s551_s11 = scalar_lea.hbm %s923_s0, 256 }
  0x37   : > { %p552_p10 = scmp.lt.u32.totalorder %s812_s24, %s923_s0  ;;  %p553_p4 = scmp.lt.u32.totalorder %s551_s11, %s546_s12 }
  0x38   : > { %p549_p5 = pnand %p548_p3, %p547_p0  ;;  %p555_p2 = scmp.lt.u32.totalorder %s546_s12, %s812_s24 }
  0x39   : > { %p554_p1 = por %p553_p4, %p552_p10 }
  0x3a   : > { %p550_p7 = pneg %p549_p5 }
  0x3b   : > { %p556_p6 = por %p555_p2, %p554_p1 }
  0x3d   : > { %p557_p8 = pnand %p556_p6, %p550_p7 }
  0x3f   : > { %560 = shalt.err (!%p557_p8)
}
  0x40   : > { %s561_s14 = scalar_lea.vmem %s814_s25, 128  ;;  %s665_s27 = smov [#allocation2]  }
  0x41   : > { %p562_p9 = scmp.ne.s32.totalorder %s814_s25, %s561_s14  ;;  %s566_s8 = sshll.u32 %s665_s27, 4  ;;  %s567_s8 = int_to_ptr.vmem [resolvable:$false] %s566_s8 }
  0x42   : > { %s568_s7 = scalar_lea.vmem %s567_s8, 256  ;;  %p569_p5 = scmp.lt.s32.totalorder %s814_s25, %s567_s8 }
  0x43   : > { %p564_p12 = pnand %p562_p9, %p548_p3  ;;  %p570_p10 = scmp.lt.s32.totalorder %s568_s7, %s561_s14 }
  0x45   : > { %p565_p0 = pneg %p564_p12  ;;  %p571_p4 = por %p570_p10, %p569_p5 }
  0x47   : > { %p572_p1 = pnand %p571_p4, %p565_p0 }
  0x49   : > { %575 = shalt.err (!%p572_p1)
}
  0x4a   : > { %458 = dma.hbm_to_vmem [thread:$0]  (!%p816_p11), %s812_s24, 128, %s814_s25, %s220_s10  }
  0x4b   : > { %p944_p7 = scmp.ne.s32.totalorder %s937_s30, 0 }
  0x4c   : > { %s848_s12 = sand.u32 (!%p944_p7), 1, %s646_s19   ;;  %p945_p3 = scmp.ne.s32.totalorder (!%p944_p7), %s935_s28, 0 }
  0x4d   : > { %240 = sbr.rel (%p944_p7) target bundleno = 420 (0x1a4), region = 40  ;;  %s433_s11 = sshll.u32 (!%p944_p7), %s848_s12, 3 }
  0x4e   : > { %s243_s16 = scalar_lea.sflag (!%p944_p7), [#allocation3], %s848_s12  ;;  %s246_s17 = scalar_lea.vmem (!%p944_p7), [#allocation2], %s433_s11 }
  0x54   : > { %629 = dma.done.wait (%p945_p3), %s243_s16, 128  }
  0x55   : > { %631 = vsyncadd (%p945_p3), %s243_s16, 4294967168  ;;  %p946_p2 = scmp.ne.s32.totalorder %s933_s26, 0 }
  0x57   : > { %633 = dma.done.wait (%p946_p2), [#allocation6], 128  }
  0x58   : > { %635 = vsyncadd (%p946_p2), [#allocation6], 4294967168  ;;  %v277_v0 = vld [vmem:[%s246_s17] sm:$0xff]  ;;  %v278_v1 = vld [vmem:[#allocation5] sm:$0xff]  ;;  %s435_s26 = sshll.u32 %s848_s12, 2  ;;  %s440_s14 = sshll.u32 %s654_s21, 6 }
  0x59   : > { %v436_v2 = vld [vmem:[%s925_s2] ss:$0 sm:$0xff]  ;;  %v279_v3 = vadd.f32 %v278_v1, %v277_v0  ;;  %s276_s27 = scalar_lea.vmem [#allocation7], %s435_s26  ;;  %s874_s16 = scalar_lea.hbm %s928_s5, %s440_s14 }
  0x5a   : > { %v437_v13 = vld [vmem:[%s926_s3] ss:$0 sm:$0xff]  ;;  %s333_s8 = sshll.u32 %s276_s27, 4  ;;  %s319_s17 = scalar_lea.sflag [#allocation4], %s848_s12  ;;  %s876_s8 = int_to_ptr.vmem [resolvable:$true] %s333_s8 }
  0x5b   : > { %v287_v4 = vadd.f32 %v436_v2, %v279_v3  ;;  %v438_v15 = vld [vmem:[%s927_s4] ss:$0 sm:$0xff]  ;;  %s576_s30 = scalar_lea.vmem %s876_s8, 64  ;;  %s666_s21 = smov [#allocation7]  }
  0x5c   : > { %p577_p11 = scmp.ne.s32.totalorder %s876_s8, %s576_s30  ;;  %s580_s24 = sshll.u32 %s666_s21, 4  ;;  %s581_s24 = int_to_ptr.vmem [resolvable:$false] %s580_s24 }
  0x5d   : > { %288 = vadd.xlane.f32.xlu0 %v287_v4  ;;  %s582_s26 = scalar_lea.vmem %s581_s24, 128  ;;  %p583_p9 = scmp.lt.s32.totalorder %s876_s8, %s581_s24 }
  0x5e   : > { %p578_p6 = pnand %p577_p11, %p798_p13  ;;  %p584_p12 = scmp.lt.s32.totalorder %s582_s26, %s576_s30 }
  0x60   : > { %p579_p8 = pneg %p578_p6  ;;  %p585_p0 = por %p584_p12, %p583_p9 }
  0x62   : > { %p586_p5 = pnand %p585_p0, %p579_p8 }
  0xea   : > { %v289_v5 = vpop.xlane.xlu0 %288 }
  0xeb   : > { %v291_v6 = vmul.f32 0.0078125, %v289_v5 }
  0xed   : > { %v292_v7 = vsub.f32 %v287_v4, %v291_v6 }
  0xef   : > { %v293_v8 = vmul.f32 %v292_v7, %v292_v7 }
  0xf1   : > { %294 = vadd.xlane.f32.xlu0 %v293_v8 }
 0x17e   : > { %v295_v9 = vpop.xlane.xlu0 %294 }
 0x17f   : > { %v296_v10 = vmul.f32 0.0078125, %v295_v9 }
 0x181   : > { %v297_v11 = vadd.f32 1e-12, %v296_v10 }
 0x183   : > { %516 = vrsqrt.f32 %v297_v11 }
 0x18d   : > { %v517_v12 = vpop.eup %516 }
 0x18e   : > { %v299_v14 = vmul.f32 %v517_v12, %v292_v7 }
 0x190   : > { %v307_v16 = vmul.f32 %v437_v13, %v299_v14 }
 0x192   : > { %v315_v17 = vadd.f32 %v438_v15, %v307_v16 }
 0x194   : > { %v316_v18 = vpack.c.bf16 %v315_v17, %v315_v17 }
 0x196   : > { %317 = vst [vmem:[%s276_s27] sm:$0xf] %v316_v18 }
 0x197   : > { %589 = shalt.err (!%p586_p5)
}
 0x198   : > { %s590_s12 = scalar_lea.hbm %s874_s16, 64  ;;  %s594_s6 = scalar_lea.hbm %s928_s5, 128 }
 0x199   : > { %p591_p10 = scmp.ne.s32.totalorder %s874_s16, %s590_s12  ;;  %p595_p7 = scmp.lt.u32.totalorder %s874_s16, %s928_s5 }
 0x19a   : > { %p596_p3 = scmp.lt.u32.totalorder %s594_s6, %s590_s12  ;;  %p598_p11 = scmp.lt.u32.totalorder %s590_s12, %s874_s16 }
 0x19b   : > { %p592_p4 = pnand %p591_p10, %p798_p13 }
 0x19c   : > { %p597_p2 = por %p596_p3, %p595_p7 }
 0x19d   : > { %p593_p1 = pneg %p592_p4 }
 0x19e   : > { %p599_p6 = por %p598_p11, %p597_p2 }
 0x1a0   : > { %p600_p8 = pnand %p599_p6, %p593_p1 }
 0x1a2   : > { %603 = shalt.err (!%p600_p8)
}
 0x1a3   : > { %449 = dma.vmem_to_hbm [thread:$0]  (%p798_p13), %s876_s8, 64, %s874_s16, %s319_s17  }
 0x1a4 PF: > { %s345_s27 = sand.u32 1, %s642_s18   ;;  %p947_p9 = scmp.ne.s32.totalorder %s936_s29, 0 }
 0x1a5   : > { %p948_p12 = scmp.ge.s32.totalorder %s662_s23, 2  ;;  %s346_s7 = scalar_lea.sflag [#allocation4], %s345_s27 }
 0x1a7   : > { %p460_p0 = pnand %p948_p12, %p947_p9 }
 0x1a9   : > { %637 = dma.done.wait (!%p460_p0), %s346_s7, 64  }
 0x1aa   : > { %639 = vsyncadd (!%p460_p0), %s346_s7, 4294967232  ;;  %s22_s23 = sadd.s32 1, %s662_s23   ;;  %s949_s18 = smov %s646_s19 }
 0x1ab   : > { %p19_p5 = scmp.ge.s32.totalorder %s22_s23, 4   ;;  %s950_s19 = smov %s650_s20 }
 0x1ac   : > { %s951_s20 = smov %s806_s15  ;;  %s952_s21 = smov %s658_s22 }
 0x1ad   : > { %s953_s22 = smov %s955_s9  ;;  %21 = sbr.rel (!%p19_p5) target bundleno = 7 (0x7), region = 90 }
 0x1b4   :  { %351 = vsyncpa [#allocation3], 1 }
 0x1b5   :  { %353 = vsyncpa [#allocation3 + $0x1], 1 }
 0x1b6   :  { %354 = vsyncpa [#allocation6], 1 }
 0x1b7   :  { %355 = vsyncpa [#allocation4], 1 }
 0x1b8   :  { %357 = vsyncpa [#allocation4 + $0x1], 1 }

</bundles_post_ra>
